<compile_context>
chip_gen: v5e
topology: v5e:2x2
jax: 0.10.0
libtpu: 0.0.40
codegen_flags: <defaults>
</compile_context>

<pallas_src>
import functools

import jax
import jax.numpy as jnp
from jax import lax
from jax.experimental import pallas as pl
from jax.experimental.pallas import tpu as pltpu


def _round_up(x, m):
    return ((x + m - 1) // m) * m


def pointnet_kernel(x_ref, *refs, num_layers):
    """Process one [tile_n, D] block of points for one batch element.

    refs = (w1, b1, w2, b2, ..., wL, bL, o_ref)
    wi: [C_in_i, C_out_i] (BN pre-folded), bi: [1, C_out_i], o_ref: [1, feat_size].
    """
    o_ref = refs[-1]
    params = refs[:-1]

    h = x_ref[...].astype(jnp.float32)                       # [tile_n, D]
    for i in range(num_layers):
        w = params[2 * i][...]
        b = params[2 * i + 1][...]
        h = jnp.dot(h, w, preferred_element_type=jnp.float32) + b
        if i < num_layers - 1:                               # ReLU on all but last layer
            h = jnp.maximum(h, 0.0)

    # Max over the points in this tile -> lane-dense [1, feat_size] row.
    part = jnp.max(h, axis=0, keepdims=True)

    j = pl.program_id(1)

    @pl.when(j == 0)
    def _():
        o_ref[...] = part.astype(o_ref.dtype)

    @pl.when(j > 0)
    def _():
        o_ref[...] = jnp.maximum(o_ref[...], part.astype(o_ref.dtype))


def init_params(key, in_channels, layer_dims, feat_size):
    """Synthetic deterministic Conv1d + BatchNorm1d parameters (eval-mode stats)."""
    dims = [in_channels] + list(layer_dims) + [feat_size]
    raw = {"w": [], "b": [], "gamma": [], "beta": [], "mean": [], "var": []}
    keys = jax.random.split(key, 6 * (len(dims) - 1))
    ki = 0
    for i in range(len(dims) - 1):
        c_in, c_out = dims[i], dims[i + 1]
        scale = 1.0 / jnp.sqrt(jnp.float32(c_in))
        raw["w"].append(scale * jax.random.normal(keys[ki], (c_out, c_in), jnp.float32)); ki += 1
        raw["b"].append(0.1 * jax.random.normal(keys[ki], (c_out,), jnp.float32)); ki += 1
        raw["gamma"].append(1.0 + 0.1 * jax.random.normal(keys[ki], (c_out,), jnp.float32)); ki += 1
        raw["beta"].append(0.1 * jax.random.normal(keys[ki], (c_out,), jnp.float32)); ki += 1
        raw["mean"].append(0.1 * jax.random.normal(keys[ki], (c_out,), jnp.float32)); ki += 1
        raw["var"].append(0.5 + jax.random.uniform(keys[ki], (c_out,), jnp.float32)); ki += 1
    return raw


def fold_params(raw, eps=1e-5):
    """Fold eval-mode BN into the 1x1-conv weights: y = x @ (W^T * s) + (b*s + t)."""
    folded = []
    for i in range(len(raw["w"])):
        w = raw["w"][i].T                                    # [C_in, C_out]
        b = raw["b"][i]
        s = raw["gamma"][i] / jnp.sqrt(raw["var"][i] + eps)
        t = raw["beta"][i] - raw["mean"][i] * s
        folded.append(w * s[None, :])
        folded.append((b * s + t).reshape(1, -1))
    return folded


def pointnet_features(x, folded_params, *, feat_size, tile_n=512):
    """x: [B, N, D] (PyTorch convention, transposed_input=False) -> [B, feat_size]."""
    B, N, D = x.shape
    num_layers = len(folded_params) // 2

    tn = min(tile_n, _round_up(N, 8))
    n_pad = _round_up(N, tn)
    x = x.astype(jnp.float32)
    if n_pad != N:
        # Pad with duplicates of point 0: duplicates leave the max unchanged.
        pad = jnp.broadcast_to(x[:, :1, :], (B, n_pad - N, D))
        x = jnp.concatenate([x, pad], axis=1)

    kern = functools.partial(pointnet_kernel, num_layers=num_layers)

    in_specs = [pl.BlockSpec((None, tn, D), lambda b, j: (b, j, 0))]
    for p in folded_params:
        in_specs.append(pl.BlockSpec(p.shape, lambda b, j, _nd=p.ndim: (0,) * _nd))

    out = pl.pallas_call(
        kern,
        out_shape=jax.ShapeDtypeStruct((B, 1, feat_size), jnp.float32),
        grid=(B, n_pad // tn),
        in_specs=in_specs,
        out_specs=pl.BlockSpec((None, 1, feat_size), lambda b, j: (b, 0, 0)),
        compiler_params=pltpu.CompilerParams(
            dimension_semantics=("parallel", "arbitrary")),
    )(x, *folded_params)
    return out.reshape(B, feat_size)


def pointnet_ref(x, raw, eps=1e-5):
    """Pure-JAX reference mirroring the PyTorch forward (eval-mode BN, global_feat=True)."""
    h = x.astype(jnp.float32)                                # [B, N, D]
    L = len(raw["w"])
    for i in range(L):
        w = raw["w"][i]                                      # [C_out, C_in]
        h = jnp.einsum("bnc,oc->bno", h, w,
                       precision=lax.Precision.HIGHEST) + raw["b"][i][None, None, :]
        s = raw["gamma"][i] / jnp.sqrt(raw["var"][i] + eps)
        h = h * s[None, None, :] + (raw["beta"][i] - raw["mean"][i] * s)[None, None, :]
        if i < L - 1:
            h = jnp.maximum(h, 0.0)                          # ReLU
    return jnp.max(h, axis=1)                                # [B, feat_size]


if __name__ == "__main__":
    B, N = 2, 16
    IN_CHANNELS = 3
    LAYER_DIMS = [64, 128]
    FEAT_SIZE = 1024

    key = jax.random.PRNGKey(0)
    kx, kp = jax.random.split(key)
    x = jax.random.normal(kx, (B, N, IN_CHANNELS), dtype=jnp.float32)

    raw = init_params(kp, IN_CHANNELS, LAYER_DIMS, FEAT_SIZE)
    folded = fold_params(raw)

    out = pointnet_features(x, folded, feat_size=FEAT_SIZE)
    out = jax.block_until_ready(out)

    ref = jax.block_until_ready(pointnet_ref(x, raw))
    assert out.shape == (B, FEAT_SIZE), out.shape
    assert jnp.allclose(out, ref, atol=1e-3, rtol=1e-3), float(jnp.max(jnp.abs(out - ref)))

    print("KERNEL_OK")
</pallas_src>

<mosaic_0001>
module attributes {stable_mosaic.version = 11 : i64} {
  func.func @pointnet_kernel(%arg0: i32, %arg1: i32, %arg2: memref<1x16x3xf32, #tpu.memory_space<vmem>>, %arg3: memref<3x64xf32, #tpu.memory_space<vmem>>, %arg4: memref<1x64xf32, #tpu.memory_space<vmem>>, %arg5: memref<64x128xf32, #tpu.memory_space<vmem>>, %arg6: memref<1x128xf32, #tpu.memory_space<vmem>>, %arg7: memref<128x1024xf32, #tpu.memory_space<vmem>>, %arg8: memref<1x1024xf32, #tpu.memory_space<vmem>>, %arg9: memref<1x1x1024xf32, #tpu.memory_space<vmem>>) attributes {dimension_semantics = [#tpu.dimension_semantics<parallel>, #tpu.dimension_semantics<arbitrary>], iteration_bounds = array<i64: 2, 1>, scalar_prefetch = 0 : i64, scratch_operands = 0 : i64, tpu.core_type = #tpu.core_type<tc>, window_params = [{transform_indices = @transform_0, window_bounds = array<i64: 1, 16, 3>}, {pipeline_mode = #tpu.pipeline_mode<synchronous>, transform_indices = @transform_1, window_bounds = array<i64: 3, 64>}, {pipeline_mode = #tpu.pipeline_mode<synchronous>, transform_indices = @transform_2, window_bounds = array<i64: 1, 64>}, {pipeline_mode = #tpu.pipeline_mode<synchronous>, transform_indices = @transform_3, window_bounds = array<i64: 64, 128>}, {pipeline_mode = #tpu.pipeline_mode<synchronous>, transform_indices = @transform_4, window_bounds = array<i64: 1, 128>}, {pipeline_mode = #tpu.pipeline_mode<synchronous>, transform_indices = @transform_5, window_bounds = array<i64: 128, 1024>}, {pipeline_mode = #tpu.pipeline_mode<synchronous>, transform_indices = @transform_6, window_bounds = array<i64: 1, 1024>}, {transform_indices = @transform_7, window_bounds = array<i64: 1, 1, 1024>}]} {
    %c0 = arith.constant 0 : index
    %c0_0 = arith.constant 0 : index
    %c0_1 = arith.constant 0 : index
    %0 = vector.load %arg2[%c0, %c0_0, %c0_1] : memref<1x16x3xf32, #tpu.memory_space<vmem>>, vector<1x16x3xf32>
    %1 = vector.shape_cast %0 : vector<1x16x3xf32> to vector<16x3xf32>
    %c0_2 = arith.constant 0 : index
    %c0_3 = arith.constant 0 : index
    %2 = vector.load %arg3[%c0_2, %c0_3] : memref<3x64xf32, #tpu.memory_space<vmem>>, vector<3x64xf32>
    %c0_4 = arith.constant 0 : index
    %c0_5 = arith.constant 0 : index
    %3 = vector.load %arg4[%c0_4, %c0_5] : memref<1x64xf32, #tpu.memory_space<vmem>>, vector<1x64xf32>
    %cst = arith.constant dense<0.000000e+00> : vector<16x64xf32>
    %4 = tpu.matmul %1, %2, %cst {dimension_numbers = #tpu.dot_dimension_numbers<[1], [0], [0], [1], [0, 0, 1, 1], [], []>} : vector<16x3xf32>, vector<3x64xf32>, vector<16x64xf32> -> vector<16x64xf32>
    %5 = vector.broadcast %3 : vector<1x64xf32> to vector<16x64xf32>
    %6 = arith.addf %4, %5 : vector<16x64xf32>
    %cst_6 = arith.constant 0.000000e+00 : f32
    %7 = vector.broadcast %cst_6 : f32 to vector<16x64xf32>
    %8 = arith.maximumf %6, %7 : vector<16x64xf32>
    %c0_7 = arith.constant 0 : index
    %c0_8 = arith.constant 0 : index
    %9 = vector.load %arg5[%c0_7, %c0_8] : memref<64x128xf32, #tpu.memory_space<vmem>>, vector<64x128xf32>
    %c0_9 = arith.constant 0 : index
    %c0_10 = arith.constant 0 : index
    %10 = vector.load %arg6[%c0_9, %c0_10] : memref<1x128xf32, #tpu.memory_space<vmem>>, vector<1x128xf32>
    %cst_11 = arith.constant dense<0.000000e+00> : vector<16x128xf32>
    %11 = tpu.matmul %8, %9, %cst_11 {dimension_numbers = #tpu.dot_dimension_numbers<[1], [0], [0], [1], [0, 0, 1, 1], [], []>} : vector<16x64xf32>, vector<64x128xf32>, vector<16x128xf32> -> vector<16x128xf32>
    %12 = vector.broadcast %10 : vector<1x128xf32> to vector<16x128xf32>
    %13 = arith.addf %11, %12 : vector<16x128xf32>
    %cst_12 = arith.constant 0.000000e+00 : f32
    %14 = vector.broadcast %cst_12 : f32 to vector<16x128xf32>
    %15 = arith.maximumf %13, %14 : vector<16x128xf32>
    %c0_13 = arith.constant 0 : index
    %c0_14 = arith.constant 0 : index
    %16 = vector.load %arg7[%c0_13, %c0_14] : memref<128x1024xf32, #tpu.memory_space<vmem>>, vector<128x1024xf32>
    %c0_15 = arith.constant 0 : index
    %c0_16 = arith.constant 0 : index
    %17 = vector.load %arg8[%c0_15, %c0_16] : memref<1x1024xf32, #tpu.memory_space<vmem>>, vector<1x1024xf32>
    %cst_17 = arith.constant dense<0.000000e+00> : vector<16x1024xf32>
    %18 = tpu.matmul %15, %16, %cst_17 {dimension_numbers = #tpu.dot_dimension_numbers<[1], [0], [0], [1], [0, 0, 1, 1], [], []>} : vector<16x128xf32>, vector<128x1024xf32>, vector<16x1024xf32> -> vector<16x1024xf32>
    %19 = vector.broadcast %17 : vector<1x1024xf32> to vector<16x1024xf32>
    %20 = arith.addf %18, %19 : vector<16x1024xf32>
    %cst_18 = arith.constant dense<0xFF800000> : vector<1024xf32>
    %21 = vector.multi_reduction <maximumf>, %20, %cst_18 [0] : vector<16x1024xf32> to vector<1024xf32>
    %22 = vector.shape_cast %21 : vector<1024xf32> to vector<1x1024xf32>
    %c0_i32 = arith.constant 0 : i32
    %23 = arith.cmpi eq, %arg1, %c0_i32 : i32
    %24 = arith.extui %23 : i1 to i32
    %c0_i32_19 = arith.constant 0 : i32
    %25 = arith.cmpi ne, %24, %c0_i32_19 : i32
    scf.if %25 {
      %c0_22 = arith.constant 0 : index
      %c0_23 = arith.constant 0 : index
      %c0_24 = arith.constant 0 : index
      %29 = vector.load %arg9[%c0_22, %c0_23, %c0_24] : memref<1x1x1024xf32, #tpu.memory_space<vmem>>, vector<1x1x1024xf32>
      %30 = vector.shape_cast %29 : vector<1x1x1024xf32> to vector<1x1024xf32>
      %31 = vector.shape_cast %22 : vector<1x1024xf32> to vector<1x1x1024xf32>
      tpu.vector_store %arg9[%c0_22, %c0_23, %c0_24], %31 {strides = array<i32>} : memref<1x1x1024xf32, #tpu.memory_space<vmem>>, vector<1x1x1024xf32>,
    } else {
    }
    %c0_i32_20 = arith.constant 0 : i32
    %26 = arith.cmpi sgt, %arg1, %c0_i32_20 : i32
    %27 = arith.extui %26 : i1 to i32
    %c0_i32_21 = arith.constant 0 : i32
    %28 = arith.cmpi ne, %27, %c0_i32_21 : i32
    scf.if %28 {
      %c0_22 = arith.constant 0 : index
      %c0_23 = arith.constant 0 : index
      %c0_24 = arith.constant 0 : index
      %29 = vector.load %arg9[%c0_22, %c0_23, %c0_24] : memref<1x1x1024xf32, #tpu.memory_space<vmem>>, vector<1x1x1024xf32>
      %30 = vector.shape_cast %29 : vector<1x1x1024xf32> to vector<1x1024xf32>
      %31 = arith.maximumf %30, %22 : vector<1x1024xf32>
      %c0_25 = arith.constant 0 : index
      %c0_26 = arith.constant 0 : index
      %c0_27 = arith.constant 0 : index
      %32 = vector.load %arg9[%c0_25, %c0_26, %c0_27] : memref<1x1x1024xf32, #tpu.memory_space<vmem>>, vector<1x1x1024xf32>
      %33 = vector.shape_cast %32 : vector<1x1x1024xf32> to vector<1x1024xf32>
      %34 = vector.shape_cast %31 : vector<1x1024xf32> to vector<1x1x1024xf32>
      tpu.vector_store %arg9[%c0_25, %c0_26, %c0_27], %34 {strides = array<i32>} : memref<1x1x1024xf32, #tpu.memory_space<vmem>>, vector<1x1x1024xf32>,
    } else {
    }
    return
  }
  func.func @transform_0(%arg0: i32, %arg1: i32) -> (i32, i32, i32) {
    %c0_i32 = arith.constant 0 : i32
    %c0_i32_0 = arith.constant 0 : i32
    return %arg0, %arg1, %c0_i32 : i32, i32, i32
  }
  func.func @transform_1(%arg0: i32, %arg1: i32) -> (i32, i32) {
    %c0_i32 = arith.constant 0 : i32
    %c0_i32_0 = arith.constant 0 : i32
    %c0_i32_1 = arith.constant 0 : i32
    return %c0_i32, %c0_i32_0 : i32, i32
  }
  func.func @transform_2(%arg0: i32, %arg1: i32) -> (i32, i32) {
    %c0_i32 = arith.constant 0 : i32
    %c0_i32_0 = arith.constant 0 : i32
    %c0_i32_1 = arith.constant 0 : i32
    return %c0_i32, %c0_i32_0 : i32, i32
  }
  func.func @transform_3(%arg0: i32, %arg1: i32) -> (i32, i32) {
    %c0_i32 = arith.constant 0 : i32
    %c0_i32_0 = arith.constant 0 : i32
    %c0_i32_1 = arith.constant 0 : i32
    return %c0_i32, %c0_i32_0 : i32, i32
  }
  func.func @transform_4(%arg0: i32, %arg1: i32) -> (i32, i32) {
    %c0_i32 = arith.constant 0 : i32
    %c0_i32_0 = arith.constant 0 : i32
    %c0_i32_1 = arith.constant 0 : i32
    return %c0_i32, %c0_i32_0 : i32, i32
  }
  func.func @transform_5(%arg0: i32, %arg1: i32) -> (i32, i32) {
    %c0_i32 = arith.constant 0 : i32
    %c0_i32_0 = arith.constant 0 : i32
    %c0_i32_1 = arith.constant 0 : i32
    return %c0_i32, %c0_i32_0 : i32, i32
  }
  func.func @transform_6(%arg0: i32, %arg1: i32) -> (i32, i32) {
    %c0_i32 = arith.constant 0 : i32
    %c0_i32_0 = arith.constant 0 : i32
    %c0_i32_1 = arith.constant 0 : i32
    return %c0_i32, %c0_i32_0 : i32, i32
  }
  func.func @transform_7(%arg0: i32, %arg1: i32) -> (i32, i32, i32) {
    %c0_i32 = arith.constant 0 : i32
    %c0_i32_0 = arith.constant 0 : i32
    %c0_i32_1 = arith.constant 0 : i32
    return %arg0, %c0_i32, %c0_i32_0 : i32, i32, i32
  }
}

</mosaic_0001>

<bundles_post_ra>
// kernel: tpu_custom_call.1
= control target key start
LH: loop header
LB: loop body
LE: loop exit
PB: predicated region body
PF: predicated region fallthrough
CT: control target
= control target key end

     0   :  { %s1439_s0 = inlined_call_operand.vmem [shape: f32[2,16,3], index: 0, kind: input, shape index: {}]   ;;  %s1440_s1 = inlined_call_operand.vmem [shape: f32[3,64], index: 1, kind: input, shape index: {}]   ;;  %s1441_s2 = inlined_call_operand.vmem [shape: f32[1,64], index: 2, kind: input, shape index: {}]   ;;  %s1442_s3 = inlined_call_operand.hbm [shape: f32[64,128], index: 3, kind: input, shape index: {}]   ;;  %s1443_s4 = inlined_call_operand.vmem [shape: f32[1,128], index: 4, kind: input, shape index: {}]   ;;  %s1444_s5 = inlined_call_operand.hbm [shape: f32[128,1024], index: 5, kind: input, shape index: {}]   ;;  %s1445_s6 = inlined_call_operand.vmem [shape: f32[1,1024], index: 6, kind: input, shape index: {}]   ;;  %s1446_s7 = inlined_call_operand.hbm [shape: f32[2,1,1024], index: 7, kind: output, shape index: {}]  }
   0x1   :  { %1447 = sst [smem:[#allocation11_spill]] %s1442_s3 }
   0x2   :  { %12 = vsyncpa [#allocation3], 0 }
   0x3   :  { %13 = vsyncpa [#allocation6], 0 }
   0x4   :  { %14 = vsyncpa [#allocation4], 0 }
   0x5   :  { %16 = vsyncpa [#allocation4 + $0x1], 0  ;;  %s1293_s24 = smov 0   ;;  %s1295_s25 = smov 0  }
   0x6   :  { %s1297_s26 = smov 0   ;;  %s1299_s27 = smov 0  }
   0x7   :  { %s1301_s28 = smov 0   ;;  %s1303_s29 = smov 0  }
   0x8 LB: > { %s995_s30 = sadd.s32 4294967295, %s1245_s29   ;;  %s996_s8 = sadd.s32 4294967294, %s1245_s29   ;;  %s1245_s29 = sphi %s1303_s29, %s22_s29   ;;  %s1241_s28 = sphi %s1301_s28, %s1457_s28   ;;  %s1237_s27 = sphi %s1299_s27, %s1456_s27   ;;  %s1233_s26 = sphi %s1297_s26, %s1455_s26   ;;  %s1229_s25 = sphi %s1295_s25, %s1454_s25   ;;  %s1225_s24 = sphi %s1293_s24, %s1453_s24  }
   0x9   : > { %s34_s9 = sadd.s32 1, %s1241_s28  ;;  %s195_s10 = sadd.s32 1, %s1233_s26 }
   0xa   : > { %p36_p0 = scmp.ge.s32.totalorder %s34_s9, 2  ;;  %p205_p1 = scmp.ne.s32.totalorder %s1233_s26, %s1229_s25 }
   0xb   : > { %p206_p2 = scmp.eq.s32.totalorder %s995_s30, 1  ;;  %p211_p3 = scmp.ne.s32.totalorder %s1229_s25, %s1225_s24 }
   0xc   : > { %s1459_s9 = smov (%p36_p0, %s34_s9), 0  ;;  %p212_p5 = scmp.eq.s32.totalorder %s996_s8, 1 }
   0xd   : > { %p1333_p4 = por %p206_p2, %p205_p1  ;;  %s192_s12 = ssub.s32 %s1241_s28, %s1459_s9 }
   0xe   : > { %p997_p6 = scmp.ge.s32.totalorder %s1245_s29, 1  ;;  %p193_p7 = scmp.eq.s32.totalorder %s192_s12, 0 }
   0xf   : > { %p1340_p8 = por %p212_p5, %p211_p3  ;;  %p219_p9 = scmp.lt.s32.totalorder %s1245_s29, 3 }
  0x10   : > { %s1346_s14 = scalar_select %p193_p7, %s1233_s26, %s195_s10  }
  0x11   : > { %p1348_p10 = pnand %p997_p6, %p219_p9  ;;  %p1352_p11 = scmp.eq.s32.totalorder %s995_s30, 0 }
  0x12   : > { %s1452_s3 = sld [smem:[#allocation11_spill]]  ;;  %s1247_s20 = smov [#allocation2]  }
  0x13   : > { %p1027_p12 = pneg %p1348_p10  ;;  %s238_s21 = sshll.u32 %s1247_s20, 4  ;;  %s239_s21 = int_to_ptr.vmem [resolvable:$true] %s238_s21 }
  0x14   : > { %s253_s30 = sshll.u32 %s1444_s5, 4  ;;  %s1248_s8 = smov 128   ;;  %s254_s30 = int_to_ptr.hbm [resolvable:$true] %s253_s30 }
  0x15   : > { %p1028_p13 = pnand %p1352_p11, %p1027_p12  ;;  %s1249_s10 = smov 8  }
  0x16   : > { %s1250_s12 = smov [#allocation5]   ;;  %s1251_s18 = smov 1024  }
  0x17   : > { %s255_s17 = sshll.u32 %s1250_s12, 4  ;;  %287 = sbr.rel (%p1348_p10) target bundleno = 478 (0x1de), region = 48  ;;  %s256_s17 = int_to_ptr.vmem [resolvable:$true] %s255_s17 }
  0x18   : > { %s236_s19 = sshll.u32 %s1452_s3, 4  ;;  %s1252_s3 = smov 64   ;;  %s237_s19 = int_to_ptr.hbm [resolvable:$true] %s236_s19 }
  0x19   : > { %1030 = dma.hbm_to_vmem [thread:$0]  (!%p1028_p13), %s237_s19, 1024, %s239_s21, [#allocation3], %s1248_s8, %s1248_s8, %s1249_s10  }
  0x1a   : > { %1033 = dma.hbm_to_vmem [thread:$0]  (!%p1028_p13), %s254_s30, 16384, %s256_s17, [#allocation6], %s1251_s18, %s1251_s18, %s1252_s3  }
  0x1c   : > { %1212 = dma.done.wait (%p1352_p11), [#allocation3], 1024  }
  0x1d   : > { %1214 = vsyncadd (%p1352_p11), [#allocation3], 4294966272 }
  0x1e   : > { %1216 = dma.done.wait (%p1352_p11), [#allocation6], 16384  }
  0x1f   : > { %1218 = vsyncadd (%p1352_p11), [#allocation6], 4294950912  ;;  %p330_p0 = scmp.lt.s32.totalorder %s1237_s27, 1  ;;  %vm353_vm0 = vcmask 1042432   ;;  %vm346_vm1 = vcmask 23552   ;;  %v389_v2 = vld [vmem:[#allocation2 + $0x38] sm:$0xff] }
  0x20   : > { %v341_v0 = vld [vmem:[%s1440_s1] sm:$0x7]  ;;  %v388_v3 = vld [vmem:[#allocation2 + $0x30] sm:$0xff]  ;;  %409 = vmatpush.msra.mxu1 %v389_v2  ;;  %v387_v4 = vld [vmem:[#allocation2 + $0x28] sm:$0xff]  ;;  %vm394_vm2 = vcmask 523264   ;;  %s326_s18 = sand.u32 1, %s1229_s25  }
  0x21   : > { %s331_s19 = scalar_select %p330_p0, %s1237_s27, 1  ;;  %1007 = vmatpush.msk.msra.mxu0 %vm353_vm0, %v341_v0  ;;  %v386_v5 = vld [vmem:[#allocation2 + $0x20] sm:$0xff]  ;;  %v385_v7 = vld [vmem:[#allocation2 + $0x18] sm:$0xff]  ;;  %v384_v8 = vld [vmem:[#allocation2 + $0x10] sm:$0xff]  ;;  %vm831_vm3 = vcmask 1040384   ;;  %vm833_vm4 = vcmask 1042434  }
  0x22   : > { %410 = vmatpush.msra.mxu1 %v388_v3  ;;  %v383_v9 = vld [vmem:[#allocation2 + $0x8] sm:$0xff]  ;;  %v382_v10 = vld [vmem:[#allocation2] sm:$0xff]  ;;  %v548_v13 = vld [vmem:[#allocation5 + $0x3d0] sm:$0xff]  ;;  %vm835_vm5 = vcmask 1041408   ;;  %vm837_vm6 = vcmask 1044484   ;;  %vm839_vm7 = vcmask 1046534  }
  0x23   : > { %s1016_s3 = sshll.u32 %s331_s19, 4  ;;  %v546_v11 = vld [vmem:[#allocation5 + $0x3c0] sm:$0xff]  ;;  %v547_v12 = vld [vmem:[#allocation5 + $0x3c8] sm:$0xff]  ;;  %v549_v14 = vld [vmem:[#allocation5 + $0x3d8] sm:$0xff]  ;;  %618 = vmatpush.msrb.mxu0 %v548_v13  ;;  %s1398_s19 = sshll.u32 %s326_s18, 3  ;;  %vm841_vm8 = vcmask 1045508  }
  0x24   : > { %s337_s21 = scalar_lea.vmem %s1439_s0, %s1016_s3  ;;  %411 = vmatpush.msra.mxu1 %v387_v4  ;;  %572 = vmatpush.msra.mxu2 %v546_v11  ;;  %v538_v15 = vld [vmem:[#allocation5 + $0x380] sm:$0xff]  ;;  %v539_v16 = vld [vmem:[#allocation5 + $0x388] sm:$0xff]  ;;  %v540_v17 = vld [vmem:[#allocation5 + $0x390] sm:$0xff]  ;;  %s1013_s3 = sshll.u32 %s1237_s27, 3  ;;  %vm843_vm9 = vcmask 1043456  }
  0x25   : > { %v339_v1 = vld [vmem:[%s337_s21] sm:$0xff]  ;;  %v340_v6 = vld [vmem:[%s337_s21 + $0x8] sm:$0xff]  ;;  %595 = vmatpush.msra.mxu3 %v547_v12  ;;  %v541_v18 = vld [vmem:[#allocation5 + $0x398] sm:$0xff]  ;;  %619 = vmatpush.msrb.mxu0 %v540_v17  ;;  %s895_s21 = scalar_lea.hbm %s1446_s7, %s1013_s3  ;;  %s328_s27 = scalar_lea.vmem [#allocation7], %s1398_s19 }
  0x26   : > { %1008 = vmatmul.msk.f32.vlgmr.msra.gmra.mxu0 %vm346_vm1, %v339_v1  ;;  %412 = vmatpush.msra.mxu1 %v386_v5  ;;  %v530_v19 = vld [vmem:[#allocation5 + $0x340] sm:$0xff]  ;;  %v531_v20 = vld [vmem:[#allocation5 + $0x348] sm:$0xff]  ;;  %v532_v21 = vld [vmem:[#allocation5 + $0x350] sm:$0xff]  ;;  %s897_s22 = sshll.u32 %s328_s27, 4  ;;  %s899_s23 = sshll.u32 %s895_s21, 4  ;;  %s898_s22 = int_to_ptr.vmem [resolvable:$true] %s897_s22  ;;  %s900_s23 = int_to_ptr.hbm [resolvable:$true] %s899_s23 }
  0x27   : > { %573 = vmatpush.msra.mxu2 %v538_v15  ;;  %596 = vmatpush.msra.mxu3 %v539_v16  ;;  %v533_v22 = vld [vmem:[#allocation5 + $0x358] sm:$0xff]  ;;  %v522_v23 = vld [vmem:[#allocation5 + $0x300] sm:$0xff]  ;;  %v523_v24 = vld [vmem:[#allocation5 + $0x308] sm:$0xff]  ;;  %s885_s16 = scalar_lea.sflag [#allocation4], %s326_s18  ;;  %s1173_s30 = sshra.s32 %s900_s23, 4  ;;  %s1174_s30 = int_to_ptr.hbm [resolvable:$true] %s1173_s30 }
  0x28   : > { %413 = vmatpush.msra.mxu1 %v385_v7  ;;  %v524_v25 = vld [vmem:[#allocation5 + $0x310] sm:$0xff]  ;;  %v525_v26 = vld [vmem:[#allocation5 + $0x318] sm:$0xff]  ;;  %620 = vmatpush.msrb.mxu0 %v532_v21  ;;  %v514_v27 = vld [vmem:[#allocation5 + $0x2c0] sm:$0xff]  ;;  %s1175_s8 = scalar_lea.hbm %s1174_s30, 8  ;;  %s1179_s17 = scalar_lea.hbm %s1446_s7, 16 }
  0x29   : > { %574 = vmatpush.msra.mxu2 %v530_v19  ;;  %597 = vmatpush.msra.mxu3 %v531_v20  ;;  %v515_v28 = vld [vmem:[#allocation5 + $0x2c8] sm:$0xff]  ;;  %v516_v29 = vld [vmem:[#allocation5 + $0x2d0] sm:$0xff]  ;;  %v517_v30 = vld [vmem:[#allocation5 + $0x2d8] sm:$0xff]  ;;  %p1176_p1 = scmp.ne.s32.totalorder %s1174_s30, %s1175_s8  ;;  %p1180_p5 = scmp.lt.s32.totalorder %s1174_s30, %s1446_s7 }
  0x2a   : > { %414 = vmatpush.msra.mxu1 %v384_v8  ;;  %621 = vmatpush.msrb.mxu0 %v524_v25  ;;  %v506_v31 = vld [vmem:[#allocation5 + $0x280] sm:$0xff]  ;;  %v507_v32 = vld [vmem:[#allocation5 + $0x288] sm:$0xff]  ;;  %v508_v33 = vld [vmem:[#allocation5 + $0x290] sm:$0xff]  ;;  %p1181_p6 = scmp.lt.s32.totalorder %s1179_s17, %s1175_s8 }
  0x2b   : > { %575 = vmatpush.msra.mxu2 %v522_v23  ;;  %598 = vmatpush.msra.mxu3 %v523_v24  ;;  %v509_v34 = vld [vmem:[#allocation5 + $0x298] sm:$0xff]  ;;  %v498_v35 = vld [vmem:[#allocation5 + $0x240] sm:$0xff]  ;;  %v499_v36 = vld [vmem:[#allocation5 + $0x248] sm:$0xff]  ;;  %p1177_p2 = pnand %p1176_p1, %p1333_p4 }
  0x2c   : > { %415 = vmatpush.msra.mxu1 %v383_v9  ;;  %622 = vmatpush.msrb.mxu0 %v516_v29  ;;  %v500_v37 = vld [vmem:[#allocation5 + $0x250] sm:$0xff]  ;;  %v501_v38 = vld [vmem:[#allocation5 + $0x258] sm:$0xff]  ;;  %v490_v39 = vld [vmem:[#allocation5 + $0x200] sm:$0xff]  ;;  %p1182_p7 = por %p1181_p6, %p1180_p5 }
  0x2d   : > { %576 = vmatpush.msra.mxu2 %v514_v27  ;;  %599 = vmatpush.msra.mxu3 %v515_v28  ;;  %v491_v40 = vld [vmem:[#allocation5 + $0x208] sm:$0xff]  ;;  %v492_v41 = vld [vmem:[#allocation5 + $0x210] sm:$0xff]  ;;  %v493_v42 = vld [vmem:[#allocation5 + $0x218] sm:$0xff]  ;;  %p1178_p3 = pneg %p1177_p2 }
  0x2e   : > { %1009 = vmatmul.msk.f32.gmra.mxu0 %vm346_vm1, %v340_v6  ;;  %416 = vmatpush.msra.mxu1 %v382_v10  ;;  %v482_v43 = vld [vmem:[#allocation5 + $0x1c0] sm:$0xff]  ;;  %v483_v44 = vld [vmem:[#allocation5 + $0x1c8] sm:$0xff]  ;;  %v484_v45 = vld [vmem:[#allocation5 + $0x1d0] sm:$0xff] }
  0x2f   : > { %577 = vmatpush.msra.mxu2 %v506_v31  ;;  %600 = vmatpush.msra.mxu3 %v507_v32  ;;  %v485_v46 = vld [vmem:[#allocation5 + $0x1d8] sm:$0xff]  ;;  %v1097_v47 = vld [vmem:[%s1441_s2] ss:$0 sm:$0xff]  ;;  %v475_v49 = vld [vmem:[#allocation5 + $0x188] sm:$0xff]  ;;  %p1183_p9 = pnand %p1182_p7, %p1178_p3 }
  0x30   : > { %641 = vmatpush.msrb.mxu1 %v549_v14  ;;  %623 = vmatpush.msrb.mxu0 %v508_v33  ;;  %v474_v48 = vld [vmem:[#allocation5 + $0x180] sm:$0xff]  ;;  %v476_v50 = vld [vmem:[#allocation5 + $0x190] sm:$0xff]  ;;  %v477_v51 = vld [vmem:[#allocation5 + $0x198] sm:$0xff] }
  0x31   : > { %578 = vmatpush.msra.mxu2 %v498_v35  ;;  %601 = vmatpush.msra.mxu3 %v499_v36  ;;  %v466_v52 = vld [vmem:[#allocation5 + $0x140] sm:$0xff]  ;;  %v467_v53 = vld [vmem:[#allocation5 + $0x148] sm:$0xff]  ;;  %v468_v55 = vld [vmem:[#allocation5 + $0x150] sm:$0xff] }
  0x32   : > { %642 = vmatpush.msrb.mxu1 %v541_v18  ;;  %624 = vmatpush.msrb.mxu0 %v500_v37  ;;  %v469_v56 = vld [vmem:[#allocation5 + $0x158] sm:$0xff]  ;;  %v458_v58 = vld [vmem:[#allocation5 + $0x100] sm:$0xff]  ;;  %v459_v59 = vld [vmem:[#allocation5 + $0x108] sm:$0xff] }
  0x33   : > { %579 = vmatpush.msra.mxu2 %v490_v39  ;;  %602 = vmatpush.msra.mxu3 %v491_v40  ;;  %v460_v60 = vld [vmem:[#allocation5 + $0x110] sm:$0xff]  ;;  %v461_v62 = vld [vmem:[#allocation5 + $0x118] sm:$0xff]  ;;  %v450_v63 = vld [vmem:[#allocation5 + $0xc0] sm:$0xff] }
  0x34   : > { %643 = vmatpush.msrb.mxu1 %v533_v22  ;;  %625 = vmatpush.msrb.mxu0 %v492_v41  ;;  %v451_v0 = vld [vmem:[#allocation5 + $0xc8] sm:$0xff]  ;;  %v452_v1 = vld [vmem:[#allocation5 + $0xd0] sm:$0xff]  ;;  %v453_v2 = vld [vmem:[#allocation5 + $0xd8] sm:$0xff] }
  0x35   : > { %580 = vmatpush.msra.mxu2 %v482_v43  ;;  %603 = vmatpush.msra.mxu3 %v483_v44  ;;  %v442_v3 = vld [vmem:[#allocation5 + $0x80] sm:$0xff]  ;;  %v443_v4 = vld [vmem:[#allocation5 + $0x88] sm:$0xff]  ;;  %v444_v5 = vld [vmem:[#allocation5 + $0x90] sm:$0xff] }
  0x36   : > { %644 = vmatpush.msrb.mxu1 %v525_v26  ;;  %626 = vmatpush.msrb.mxu0 %v484_v45  ;;  %v445_v6 = vld [vmem:[#allocation5 + $0x98] sm:$0xff]  ;;  %v434_v7 = vld [vmem:[#allocation5 + $0x40] sm:$0xff]  ;;  %v435_v9 = vld [vmem:[#allocation5 + $0x48] sm:$0xff] }
  0x37   : > { %581 = vmatpush.msra.mxu2 %v474_v48  ;;  %604 = vmatpush.msra.mxu3 %v475_v49  ;;  %v436_v10 = vld [vmem:[#allocation5 + $0x50] sm:$0xff]  ;;  %v437_v12 = vld [vmem:[#allocation5 + $0x58] sm:$0xff]  ;;  %v426_v13 = vld [vmem:[#allocation5] sm:$0xff] }
  0x38   : > { %645 = vmatpush.msrb.mxu1 %v517_v30  ;;  %627 = vmatpush.msrb.mxu0 %v476_v50  ;;  %v427_v14 = vld [vmem:[#allocation5 + $0x8] sm:$0xff]  ;;  %v428_v16 = vld [vmem:[#allocation5 + $0x10] sm:$0xff]  ;;  %v429_v17 = vld [vmem:[#allocation5 + $0x18] sm:$0xff] }
  0x39   : > { %582 = vmatpush.msra.mxu2 %v466_v52  ;;  %605 = vmatpush.msra.mxu3 %v467_v53  ;;  %v550_v18 = vld [vmem:[#allocation5 + $0x3e0] sm:$0xff]  ;;  %v551_v19 = vld [vmem:[#allocation5 + $0x3e8] sm:$0xff]  ;;  %v552_v20 = vld [vmem:[#allocation5 + $0x3f0] sm:$0xff] }
  0x3a   : > { %646 = vmatpush.msrb.mxu1 %v509_v34  ;;  %628 = vmatpush.msrb.mxu0 %v468_v55  ;;  %v553_v21 = vld [vmem:[#allocation5 + $0x3f8] sm:$0xff]  ;;  %v542_v22 = vld [vmem:[#allocation5 + $0x3a0] sm:$0xff]  ;;  %v543_v23 = vld [vmem:[#allocation5 + $0x3a8] sm:$0xff] }
  0x3b   : > { %583 = vmatpush.msra.mxu2 %v458_v58  ;;  %606 = vmatpush.msra.mxu3 %v459_v59  ;;  %v544_v24 = vld [vmem:[#allocation5 + $0x3b0] sm:$0xff]  ;;  %v545_v25 = vld [vmem:[#allocation5 + $0x3b8] sm:$0xff]  ;;  %v534_v26 = vld [vmem:[#allocation5 + $0x360] sm:$0xff] }
  0x3c   : > { %647 = vmatpush.msrb.mxu1 %v501_v38  ;;  %629 = vmatpush.msrb.mxu0 %v460_v60  ;;  %v535_v27 = vld [vmem:[#allocation5 + $0x368] sm:$0xff]  ;;  %v536_v28 = vld [vmem:[#allocation5 + $0x370] sm:$0xff]  ;;  %v537_v29 = vld [vmem:[#allocation5 + $0x378] sm:$0xff] }
  0x3d   : > { %584 = vmatpush.msra.mxu2 %v450_v63  ;;  %607 = vmatpush.msra.mxu3 %v451_v0  ;;  %v526_v30 = vld [vmem:[#allocation5 + $0x320] sm:$0xff]  ;;  %v527_v31 = vld [vmem:[#allocation5 + $0x328] sm:$0xff]  ;;  %v528_v32 = vld [vmem:[#allocation5 + $0x330] sm:$0xff] }
  0x3e   : > { %648 = vmatpush.msrb.mxu1 %v493_v42  ;;  %630 = vmatpush.msrb.mxu0 %v452_v1  ;;  %v529_v33 = vld [vmem:[#allocation5 + $0x338] sm:$0xff]  ;;  %v518_v34 = vld [vmem:[#allocation5 + $0x2e0] sm:$0xff]  ;;  %v519_v35 = vld [vmem:[#allocation5 + $0x2e8] sm:$0xff] }
  0x3f   : > { %585 = vmatpush.msra.mxu2 %v442_v3  ;;  %608 = vmatpush.msra.mxu3 %v443_v4  ;;  %v520_v36 = vld [vmem:[#allocation5 + $0x2f0] sm:$0xff]  ;;  %v521_v37 = vld [vmem:[#allocation5 + $0x2f8] sm:$0xff]  ;;  %v510_v38 = vld [vmem:[#allocation5 + $0x2a0] sm:$0xff] }
  0x40   : > { %649 = vmatpush.msrb.mxu1 %v485_v46  ;;  %631 = vmatpush.msrb.mxu0 %v444_v5  ;;  %v511_v39 = vld [vmem:[#allocation5 + $0x2a8] sm:$0xff]  ;;  %v512_v40 = vld [vmem:[#allocation5 + $0x2b0] sm:$0xff]  ;;  %v513_v41 = vld [vmem:[#allocation5 + $0x2b8] sm:$0xff] }
  0x41   : > { %586 = vmatpush.msra.mxu2 %v434_v7  ;;  %609 = vmatpush.msra.mxu3 %v435_v9  ;;  %v502_v42 = vld [vmem:[#allocation5 + $0x260] sm:$0xff]  ;;  %v503_v43 = vld [vmem:[#allocation5 + $0x268] sm:$0xff]  ;;  %v504_v44 = vld [vmem:[#allocation5 + $0x270] sm:$0xff] }
  0x42   : > { %650 = vmatpush.msrb.mxu1 %v477_v51  ;;  %632 = vmatpush.msrb.mxu0 %v436_v10  ;;  %v505_v45 = vld [vmem:[#allocation5 + $0x278] sm:$0xff]  ;;  %v494_v46 = vld [vmem:[#allocation5 + $0x220] sm:$0xff]  ;;  %v496_v48 = vld [vmem:[#allocation5 + $0x230] sm:$0xff] }
  0x43   : > { %587 = vmatpush.msra.mxu2 %v426_v13  ;;  %610 = vmatpush.msra.mxu3 %v427_v14  ;;  %v497_v49 = vld [vmem:[#allocation5 + $0x238] sm:$0xff]  ;;  %v486_v50 = vld [vmem:[#allocation5 + $0x1e0] sm:$0xff]  ;;  %v487_v51 = vld [vmem:[#allocation5 + $0x1e8] sm:$0xff] }
  0x44   : > { %651 = vmatpush.msrb.mxu1 %v469_v56  ;;  %633 = vmatpush.msrb.mxu0 %v428_v16  ;;  %v488_v52 = vld [vmem:[#allocation5 + $0x1f0] sm:$0xff]  ;;  %v489_v53 = vld [vmem:[#allocation5 + $0x1f8] sm:$0xff]  ;;  %v479_v55 = vld [vmem:[#allocation5 + $0x1a8] sm:$0xff] }
  0x45   : > { %664 = vmatpush.msrb.mxu2 %v550_v18  ;;  %687 = vmatpush.msrb.mxu3 %v551_v19  ;;  %v480_v56 = vld [vmem:[#allocation5 + $0x1b0] sm:$0xff]  ;;  %v470_v58 = vld [vmem:[#allocation5 + $0x160] sm:$0xff]  ;;  %v471_v59 = vld [vmem:[#allocation5 + $0x168] sm:$0xff] }
  0x46   : > { %652 = vmatpush.msrb.mxu1 %v461_v62  ;;  %710 = vmatpush.msra.mxu0 %v552_v20  ;;  %v472_v60 = vld [vmem:[#allocation5 + $0x170] sm:$0xff]  ;;  %v462_v62 = vld [vmem:[#allocation5 + $0x120] sm:$0xff]  ;;  %v463_v63 = vld [vmem:[#allocation5 + $0x128] sm:$0xff] }
  0x47   : > { %665 = vmatpush.msrb.mxu2 %v542_v22  ;;  %688 = vmatpush.msrb.mxu3 %v543_v23  ;;  %v464_v0 = vld [vmem:[#allocation5 + $0x130] sm:$0xff]  ;;  %v465_v1 = vld [vmem:[#allocation5 + $0x138] sm:$0xff]  ;;  %v455_v3 = vld [vmem:[#allocation5 + $0xe8] sm:$0xff] }
  0x48   : > { %653 = vmatpush.msrb.mxu1 %v453_v2  ;;  %711 = vmatpush.msra.mxu0 %v544_v24  ;;  %v454_v2 = vld [vmem:[#allocation5 + $0xe0] sm:$0xff]  ;;  %v456_v4 = vld [vmem:[#allocation5 + $0xf0] sm:$0xff]  ;;  %v457_v5 = vld [vmem:[#allocation5 + $0xf8] sm:$0xff] }
  0x49   : > { %666 = vmatpush.msrb.mxu2 %v534_v26  ;;  %689 = vmatpush.msrb.mxu3 %v535_v27  ;;  %v447_v7 = vld [vmem:[#allocation5 + $0xa8] sm:$0xff]  ;;  %v449_v9 = vld [vmem:[#allocation5 + $0xb8] sm:$0xff]  ;;  %v438_v10 = vld [vmem:[#allocation5 + $0x60] sm:$0xff] }
  0x4a   : > { %654 = vmatpush.msrb.mxu1 %v445_v6  ;;  %712 = vmatpush.msra.mxu0 %v536_v28  ;;  %v446_v6 = vld [vmem:[#allocation5 + $0xa0] sm:$0xff]  ;;  %v441_v13 = vld [vmem:[#allocation5 + $0x78] sm:$0xff]  ;;  %v432_v16 = vld [vmem:[#allocation5 + $0x30] sm:$0xff] }
  0x4b   : > { %667 = vmatpush.msrb.mxu2 %v526_v30  ;;  %690 = vmatpush.msrb.mxu3 %v527_v31  ;;  %v430_v14 = vld [vmem:[#allocation5 + $0x20] sm:$0xff] }
  0x4c   : > { %655 = vmatpush.msrb.mxu1 %v437_v12  ;;  %713 = vmatpush.msra.mxu0 %v528_v32  ;;  %v440_v12 = vld [vmem:[#allocation5 + $0x70] sm:$0xff]  ;;  %v1098_v18 = vld [vmem:[%s1443_s4] ss:$0 sm:$0xff] }
  0x4d   : > { %668 = vmatpush.msrb.mxu2 %v518_v34  ;;  %691 = vmatpush.msrb.mxu3 %v519_v35  ;;  %v554_v27 = vld [vmem:[%s1445_s6] sm:$0xff] }
  0x4e   : > { %656 = vmatpush.msrb.mxu1 %v429_v17  ;;  %714 = vmatpush.msra.mxu0 %v520_v36  ;;  %v433_v17 = vld [vmem:[#allocation5 + $0x38] sm:$0xff]  ;;  %v558_v30 = vperm.slane %v554_v27, 2  ;;  %v557_v36 = vperm.slane %v554_v27, 1 }
  0x4f   : > { %669 = vmatpush.msrb.mxu2 %v510_v38  ;;  %692 = vmatpush.msrb.mxu3 %v511_v39 }
  0x50   : > { %715 = vmatpush.msra.mxu0 %v512_v40  ;;  %v556_v40 = vperm.slane %v554_v27, 0 }
  0x51   : > { %670 = vmatpush.msrb.mxu2 %v502_v42  ;;  %693 = vmatpush.msrb.mxu3 %v503_v43 }
  0x52   : > { %716 = vmatpush.msra.mxu0 %v504_v44 }
  0x53   : > { %671 = vmatpush.msrb.mxu2 %v494_v46 }
  0x54   : > { %717 = vmatpush.msra.mxu0 %v496_v48 }
  0x55   : > { %672 = vmatpush.msrb.mxu2 %v486_v50 }
  0x56   : > { %718 = vmatpush.msra.mxu0 %v488_v52 }
  0x58   : > { %719 = vmatpush.msra.mxu0 %v480_v56  ;;  %v562_v56 = vperm.slane %v554_v27, 6 }
  0x5a   : > { %720 = vmatpush.msra.mxu0 %v472_v60 }
  0x5c   : > { %721 = vmatpush.msra.mxu0 %v464_v0  ;;  %v560_v0 = vperm.slane %v554_v27, 4 }
  0x5e   : > { %722 = vmatpush.msra.mxu0 %v456_v4 }
  0xa3   : > { %v374_v54 = vpop.f32.mrf.mxu0 }
  0xa4   : > { %v375_v57 = vadd.f32 %v1097_v47, %v374_v54  ;;  %v478_v54 = vld [vmem:[#allocation5 + $0x1a0] sm:$0xff] }
  0xa5   : > { %673 = vmatpush.msrb.mxu2 %v478_v54 }
  0xa6   : > { %v380_v61 = vmax.f32 %v375_v57, 0.0  ;;  %v481_v57 = vld [vmem:[#allocation5 + $0x1b8] sm:$0xff] }
  0xa7   : > { %674 = vmatpush.msrb.mxu2 %v470_v58 }
  0xa8   : > { %1010 = vmatmul.msk.f32.vlgmr.msra.gmra.mxu1 %vm394_vm2, %v380_v61  ;;  %v473_v61 = vld [vmem:[#allocation5 + $0x178] sm:$0xff] }
  0xa9   : > { %733 = vmatpush.msra.mxu1 %v553_v21  ;;  %675 = vmatpush.msrb.mxu2 %v462_v62 }
  0xab   : > { %v377_v8 = vpop.f32.mrf.mxu0  ;;  %734 = vmatpush.msra.mxu1 %v545_v25  ;;  %676 = vmatpush.msrb.mxu2 %v454_v2 }
  0xac   : > { %v378_v11 = vadd.f32 %v1097_v47, %v377_v8  ;;  %v495_v47 = vld [vmem:[#allocation5 + $0x228] sm:$0xff]  ;;  %v448_v8 = vld [vmem:[#allocation5 + $0xb0] sm:$0xff] }
  0xad   : > { %735 = vmatpush.msra.mxu1 %v537_v29  ;;  %694 = vmatpush.msrb.mxu3 %v495_v47 }
  0xae   : > { %v381_v15 = vmax.f32 %v378_v11, 0.0  ;;  %677 = vmatpush.msrb.mxu2 %v446_v6  ;;  %v439_v11 = vld [vmem:[#allocation5 + $0x68] sm:$0xff]  ;;  %723 = vmatpush.msra.mxu0 %v448_v8  ;;  %v561_v8 = vperm.slane %v554_v27, 5 }
  0xaf   : > { %736 = vmatpush.msra.mxu1 %v529_v33  ;;  %695 = vmatpush.msrb.mxu3 %v487_v51  ;;  %v559_v33 = vperm.slane %v554_v27, 3 }
  0xb0   : > { %1011 = vmatmul.msk.f32.gmra.mxu1 %vm394_vm2, %v381_v15  ;;  %v431_v15 = vld [vmem:[#allocation5 + $0x28] sm:$0xff]  ;;  %678 = vmatpush.msrb.mxu2 %v438_v10 }
  0xb1   : > { %737 = vmatpush.msra.mxu1 %v521_v37  ;;  %696 = vmatpush.msrb.mxu3 %v479_v55 }
  0xb2   : > { %724 = vmatpush.msra.mxu0 %v440_v12  ;;  %679 = vmatpush.msrb.mxu2 %v430_v14 }
  0xb3   : > { %738 = vmatpush.msra.mxu1 %v513_v41  ;;  %697 = vmatpush.msrb.mxu3 %v471_v59 }
  0xb4   : > { %725 = vmatpush.msra.mxu0 %v432_v16 }
  0xb5   : > { %739 = vmatpush.msra.mxu1 %v505_v45  ;;  %698 = vmatpush.msrb.mxu3 %v463_v63 }
  0xb7   : > { %740 = vmatpush.msra.mxu1 %v497_v49  ;;  %699 = vmatpush.msrb.mxu3 %v455_v3 }
  0xb9   : > { %741 = vmatpush.msra.mxu1 %v489_v53  ;;  %700 = vmatpush.msrb.mxu3 %v447_v7 }
  0xbb   : > { %742 = vmatpush.msra.mxu1 %v481_v57  ;;  %701 = vmatpush.msrb.mxu3 %v439_v11  ;;  %v563_v57 = vperm.slane %v554_v27, 7 }
  0xbd   : > { %743 = vmatpush.msra.mxu1 %v473_v61  ;;  %702 = vmatpush.msrb.mxu3 %v431_v15 }
  0xbf   : > { %744 = vmatpush.msra.mxu1 %v465_v1 }
  0xc1   : > { %745 = vmatpush.msra.mxu1 %v457_v5 }
  0xc3   : > { %746 = vmatpush.msra.mxu1 %v449_v9 }
  0xc5   : > { %747 = vmatpush.msra.mxu1 %v441_v13 }
  0xc7   : > { %748 = vmatpush.msra.mxu1 %v433_v17 }
 0x125   : > { %v418_v19 = vpop.f32.mrf.mxu1 }
 0x126   : > { %v419_v20 = vadd.f32 %v1098_v18, %v418_v19 }
 0x128   : > { %v424_v21 = vmax.f32 %v419_v20, 0.0 }
 0x12a   : > { %588 = vmatmul.f32.vlgmr.msra.gmra.mxu2 %v424_v21  ;;  %611 = vmatmul.f32.vlgmr.msra.gmra.mxu3 %v424_v21 }
 0x12b   : > { %634 = vmatmul.f32.vlgmr.msrb.gmra.mxu0 %v424_v21  ;;  %657 = vmatmul.f32.vlgmr.msrb.gmra.mxu1 %v424_v21 }
 0x12d   : > { %v421_v22 = vpop.f32.mrf.mxu1 }
 0x12e   : > { %v422_v23 = vadd.f32 %v1098_v18, %v421_v22 }
 0x130   : > { %v425_v24 = vmax.f32 %v422_v23, 0.0 }
 0x132   : > { %591 = vmatmul.f32.gmra.mxu2 %v425_v24  ;;  %614 = vmatmul.f32.gmra.mxu3 %v425_v24 }
 0x133   : > { %637 = vmatmul.f32.gmra.mxu0 %v425_v24  ;;  %660 = vmatmul.f32.gmra.mxu1 %v425_v24 }
 0x13a   : > { %680 = vmatmul.f32.vlgmr.msrb.gmra.mxu2 %v424_v21  ;;  %703 = vmatmul.f32.vlgmr.msrb.gmra.mxu3 %v424_v21 }
 0x13b   : > { %726 = vmatmul.f32.vlgmr.msra.gmra.mxu0 %v424_v21  ;;  %749 = vmatmul.f32.vlgmr.msra.gmra.mxu1 %v424_v21 }
 0x142   : > { %683 = vmatmul.f32.gmra.mxu2 %v425_v24  ;;  %706 = vmatmul.f32.gmra.mxu3 %v425_v24 }
 0x143   : > { %729 = vmatmul.f32.gmra.mxu0 %v425_v24  ;;  %752 = vmatmul.f32.gmra.mxu1 %v425_v24 }
 0x1a8   : > { %v635_v25 = vpop.f32.mrf.mxu0  ;;  %v658_v26 = vpop.f32.mrf.mxu1 }
 0x1a9   : > { %v636_v35 = vadd.f32 %v635_v25, %v558_v30  ;;  %v659_v39 = vadd.f32 %v658_v26, %v559_v33 }
 0x1ad   : > { %v589_v28 = vpop.f32.mrf.mxu2  ;;  %v612_v29 = vpop.f32.mrf.mxu3 }
 0x1ae   : > { %v613_v43 = vadd.f32 %v612_v29, %v557_v36  ;;  %v590_v51 = vadd.f32 %v589_v28, %v556_v40 }
 0x1b0   : > { %v638_v31 = vpop.f32.mrf.mxu0  ;;  %v661_v32 = vpop.f32.mrf.mxu1 }
 0x1b1   : > { %v639_v34 = vadd.f32 %v638_v31, %v558_v30  ;;  %v662_v37 = vadd.f32 %v661_v32, %v559_v33 }
 0x1b3   : > { %v770_v38 = vmax.f32 %v636_v35, %v639_v34  ;;  %v777_v45 = vmax.f32 %v659_v39, %v662_v37 }
 0x1b5   : > { %v592_v41 = vpop.f32.mrf.mxu2  ;;  %v615_v42 = vpop.f32.mrf.mxu3  ;;  %v771_v47 = vrot.slane %v770_v38, 4  ;;  %v778_v53 = vrot.slane %v777_v45, 4 }
 0x1b6   : > { %v616_v44 = vadd.f32 %v615_v42, %v557_v36  ;;  %v593_v46 = vadd.f32 %v592_v41, %v556_v40 }
 0x1b7   : > { %v772_v55 = vmax.f32 %v770_v38, %v771_v47  ;;  %v779_v61 = vmax.f32 %v777_v45, %v778_v53 }
 0x1b8   : > { %v763_v48 = vmax.f32 %v613_v43, %v616_v44  ;;  %v727_v49 = vpop.f32.mrf.mxu0  ;;  %v750_v50 = vpop.f32.mrf.mxu1  ;;  %v756_v54 = vmax.f32 %v590_v51, %v593_v46 }
 0x1b9   : > { %v773_v63 = vrot.slane %v772_v55, 2  ;;  %v728_v3 = vadd.f32 %v727_v49, %v562_v56  ;;  %v751_v4 = vadd.f32 %v750_v50, %v563_v57  ;;  %v780_v9 = vrot.slane %v779_v61, 2 }
 0x1ba   : > { %v764_v52 = vrot.slane %v763_v48, 4  ;;  %v757_v62 = vrot.slane %v756_v54, 4 }
 0x1bb   : > { %v774_v13 = vmax.f32 %v772_v55, %v773_v63  ;;  %v781_v23 = vmax.f32 %v779_v61, %v780_v9 }
 0x1bc   : > { %v765_v60 = vmax.f32 %v763_v48, %v764_v52  ;;  %v758_v10 = vmax.f32 %v756_v54, %v757_v62 }
 0x1bd   : > { %v681_v58 = vpop.f32.mrf.mxu2  ;;  %v704_v59 = vpop.f32.mrf.mxu3  ;;  %v775_v31 = vrot.slane %v774_v13, 1  ;;  %v782_v35 = vrot.slane %v781_v23, 1 }
 0x1be   : > { %v766_v7 = vrot.slane %v765_v60, 2  ;;  %v682_v14 = vadd.f32 %v681_v58, %v560_v0  ;;  %v705_v20 = vadd.f32 %v704_v59, %v561_v8  ;;  %v759_v24 = vrot.slane %v758_v10, 2 }
 0x1bf   : > { %v776_v46 = vmax.f32 %v774_v13, %v775_v31  ;;  %v783_v47 = vmax.f32 %v781_v23, %v782_v35 }
 0x1c0   : > { %v730_v1 = vpop.f32.mrf.mxu0  ;;  %v753_v2 = vpop.f32.mrf.mxu1  ;;  %v767_v19 = vmax.f32 %v765_v60, %v766_v7  ;;  %v760_v36 = vmax.f32 %v758_v10, %v759_v24 }
 0x1c1   : > { %v731_v5 = vadd.f32 %v730_v1, %v562_v56  ;;  %v754_v6 = vadd.f32 %v753_v2, %v563_v57  ;;  %v825_v56 = vrot.slane %v776_v46, 6  ;;  %v826_v57 = vrot.slane %v783_v47, 5 }
 0x1c2   : > { %v768_v32 = vrot.slane %v767_v19, 1  ;;  %v761_v48 = vrot.slane %v760_v36, 1 }
 0x1c3   : > { %v798_v11 = vmax.f32 %v728_v3, %v731_v5  ;;  %v805_v12 = vmax.f32 %v751_v4, %v754_v6  ;;  %v834_v2 = vsel %vm833_vm4, %v825_v56, %v826_v57 }
 0x1c4   : > { %v769_v43 = vmax.f32 %v767_v19, %v768_v32  ;;  %v762_v58 = vmax.f32 %v760_v36, %v761_v48 }
 0x1c5   : > { %v799_v15 = vrot.slane %v798_v11, 4  ;;  %v806_v16 = vrot.slane %v805_v12, 4  ;;  %v684_v17 = vpop.f32.mrf.mxu2  ;;  %v707_v18 = vpop.f32.mrf.mxu3 }
 0x1c6   : > { %v685_v21 = vadd.f32 %v684_v17, %v560_v0  ;;  %v708_v22 = vadd.f32 %v707_v18, %v561_v8  ;;  %v824_v53 = vrot.slane %v769_v43, 7 }
 0x1c7   : > { %v800_v25 = vmax.f32 %v798_v11, %v799_v15  ;;  %v807_v26 = vmax.f32 %v805_v12, %v806_v16 }
 0x1c8   : > { %v784_v28 = vmax.f32 %v682_v14, %v685_v21  ;;  %v791_v27 = vmax.f32 %v705_v20, %v708_v22  ;;  %v832_v1 = vsel %vm831_vm3, %v762_v58, %v824_v53 }
 0x1c9   : > { %v801_v29 = vrot.slane %v800_v25, 2  ;;  %v808_v30 = vrot.slane %v807_v26, 2  ;;  %v836_v5 = vsel %vm835_vm5, %v832_v1, %v834_v2 }
 0x1ca   : > { %v785_v33 = vrot.slane %v784_v28, 4  ;;  %v792_v34 = vrot.slane %v791_v27, 4 }
 0x1cb   : > { %v802_v37 = vmax.f32 %v800_v25, %v801_v29  ;;  %v809_v38 = vmax.f32 %v807_v26, %v808_v30 }
 0x1cc   : > { %v786_v39 = vmax.f32 %v784_v28, %v785_v33  ;;  %v793_v40 = vmax.f32 %v791_v27, %v792_v34 }
 0x1cd   : > { %v803_v41 = vrot.slane %v802_v37, 1  ;;  %v810_v42 = vrot.slane %v809_v38, 1 }
 0x1ce   : > { %v787_v44 = vrot.slane %v786_v39, 2  ;;  %v794_v45 = vrot.slane %v793_v40, 2 }
 0x1cf   : > { %v804_v49 = vmax.f32 %v802_v37, %v803_v41  ;;  %v811_v50 = vmax.f32 %v809_v38, %v810_v42 }
 0x1d0   : > { %v788_v51 = vmax.f32 %v786_v39, %v787_v44  ;;  %v795_v52 = vmax.f32 %v793_v40, %v794_v45 }
 0x1d1   : > { %v829_v59 = vrot.slane %v804_v49, 2  ;;  %v830_v60 = vrot.slane %v811_v50, 1 }
 0x1d2   : > { %v789_v54 = vrot.slane %v788_v51, 1  ;;  %v796_v55 = vrot.slane %v795_v52, 1 }
 0x1d3   : > { %v840_v4 = vsel %vm839_vm7, %v829_v59, %v830_v60 }
 0x1d4   : > { %v790_v61 = vmax.f32 %v788_v51, %v789_v54  ;;  %v797_v62 = vmax.f32 %v795_v52, %v796_v55 }
 0x1d6   : > { %v827_v63 = vrot.slane %v790_v61, 4  ;;  %v828_v0 = vrot.slane %v797_v62, 3 }
 0x1d8   : > { %v838_v3 = vsel %vm837_vm6, %v827_v63, %v828_v0 }
 0x1d9   : > { %v842_v6 = vsel %vm841_vm8, %v838_v3, %v840_v4 }
 0x1da   : > { %v844_v7 = vsel %vm843_vm9, %v836_v5, %v842_v6 }
 0x1db   : > { %846 = vst [vmem:[%s328_s27] sm:$0xff] %v844_v7 }
 0x1dc   : > { %1186 = shalt.err (!%p1183_p9)
}
 0x1dd   : > { %1025 = dma.vmem_to_hbm [thread:$0]  (%p1333_p4), %s898_s22, 128, %s900_s23, %s885_s16  }
 0x1de PF: > { %p1042_p10 = scmp.ge.s32.totalorder %s1245_s29, 2  ;;  %s911_s18 = sand.u32 1, %s1225_s24  }
 0x1df   : > { %s912_s15 = scalar_lea.sflag [#allocation4], %s911_s18 }
 0x1e0   : > { %p1035_p11 = pnand %p1042_p10, %p1340_p8 }
 0x1e2   : > { %p1036_p12 = pneg %p1035_p11 }
 0x1e4   : > { %1220 = dma.done.wait (%p1036_p12), %s912_s15, 128  }
 0x1e5   : > { %1222 = vsyncadd (%p1036_p12), %s912_s15, 4294967168  ;;  %s22_s29 = sadd.s32 1, %s1245_s29   ;;  %s1453_s24 = smov %s1229_s25 }
 0x1e6   : > { %p19_p13 = scmp.ge.s32.totalorder %s22_s29, 4   ;;  %s1454_s25 = smov %s1233_s26 }
 0x1e7   : > { %s1455_s26 = smov %s1346_s14  ;;  %s1456_s27 = smov %s1241_s28 }
 0x1e8   : > { %s1457_s28 = smov %s1459_s9  ;;  %21 = sbr.rel (!%p19_p13) target bundleno = 8 (0x8), region = 100 }
 0x1ed   :  { %918 = vsyncpa [#allocation3], 1 }
 0x1ee   :  { %920 = vsyncpa [#allocation3 + $0x1], 1 }
 0x1ef   :  { %921 = vsyncpa [#allocation6], 1 }
 0x1f0   :  { %922 = vsyncpa [#allocation4], 1 }
 0x1f1   :  { %924 = vsyncpa [#allocation4 + $0x1], 1 }

</bundles_post_ra>
